<compile_context>
chip_gen: v6e
topology: v6e:2x2x1
jax: 0.10.0
libtpu: 0.0.40
codegen_flags: <defaults>
</compile_context>

<pallas_src>
import functools

import jax
import jax.numpy as jnp
from jax.experimental import pallas as pl
from jax.experimental.pallas import tpu as pltpu


def _round_up(n: int, m: int) -> int:
    return ((n + m - 1) // m) * m


def _mlp_kernel(xT_ref, w1_ref, b1_ref, w2_ref, b2_ref, w3_ref, b3_ref, o_ref):
    """Batch-on-lanes 3-layer MLP; activations are (features, batch_tile)."""
    cdt = w1_ref.dtype  # compute dtype of the MXU inputs (bf16 or f32)

    # fc1 + relu : (hid_p, tb) = (hid_p, sd_p) @ (sd_p, tb)
    h = jnp.dot(w1_ref[...], xT_ref[...], preferred_element_type=jnp.float32)
    h = jnp.maximum(h + b1_ref[...], 0.0)          # (hid_p,1) broadcasts over lanes (f32 VPU)

    # fc2 + relu
    h = jnp.dot(w2_ref[...], h.astype(cdt), preferred_element_type=jnp.float32)
    h = jnp.maximum(h + b2_ref[...], 0.0)

    # fc3 (no non-linearity, matches the PyTorch module)
    out = jnp.dot(w3_ref[...], h.astype(cdt), preferred_element_type=jnp.float32)
    o_ref[...] = out + b3_ref[0, 0]                # scalar bias from SMEM


def network_forward(x, params, *, tb=None, compute_dtype=jnp.bfloat16):
    """3-layer MLP forward pass as a single Pallas kernel.

    x       : (B, state_dim) float32
    params  : PyTorch-convention weights:
              w1 (hidden, state_dim), b1 (hidden,)
              w2 (hidden, hidden),    b2 (hidden,)
              w3 (1, hidden),         b3 (1,)
    returns : (B, 1) float32
    """
    B, state_dim = x.shape
    hidden = params["w1"].shape[0]

    # TPU-friendly padded sizes.
    sd_p = _round_up(state_dim, 8)     # sublane-aligned fc1 contraction dim
    hid_p = _round_up(hidden, 128)     # lane-aligned hidden dim (full MXU tile for fc2)
    out_p = 8                          # pad the single output row to 8 sublanes

    # Lane tile over the batch; pad ragged batches instead of asserting.
    if tb is None:
        tb = min(512, _round_up(B, 128))
    tb = _round_up(tb, 128)
    B_pad = _round_up(B, tb)
    grid = (B_pad // tb,)

    f32 = jnp.float32
    cdt = compute_dtype

    # Batch on the lane (last) axis: x transposed and zero-padded.
    xT = jnp.zeros((sd_p, B_pad), cdt).at[:state_dim, :B].set(x.T.astype(cdt))

    # Weights stay in PyTorch (out_features, in_features) layout so the kernel
    # computes W @ x^T directly; zero-pad to aligned shapes and cast for the MXU.
    w1 = jnp.zeros((hid_p, sd_p), cdt).at[:hidden, :state_dim].set(params["w1"].astype(cdt))
    w2 = jnp.zeros((hid_p, hid_p), cdt).at[:hidden, :hidden].set(params["w2"].astype(cdt))
    w3 = jnp.zeros((out_p, hid_p), cdt).at[:1, :hidden].set(params["w3"].astype(cdt))
    # Biases stay f32: accumulation / elementwise path is f32 on every generation.
    b1 = jnp.zeros((hid_p, 1), f32).at[:hidden, 0].set(params["b1"].astype(f32))
    b2 = jnp.zeros((hid_p, 1), f32).at[:hidden, 0].set(params["b2"].astype(f32))
    b3 = params["b3"].astype(f32).reshape(1, 1)

    in_specs = [
        pl.BlockSpec((sd_p, tb), lambda i: (0, i)),         # x^T tile over batch lanes
        pl.BlockSpec((hid_p, sd_p), lambda i: (0, 0)),      # w1 (resident)
        pl.BlockSpec((hid_p, 1), lambda i: (0, 0)),         # b1
        pl.BlockSpec((hid_p, hid_p), lambda i: (0, 0)),     # w2
        pl.BlockSpec((hid_p, 1), lambda i: (0, 0)),         # b2
        pl.BlockSpec((out_p, hid_p), lambda i: (0, 0)),     # w3
        pl.BlockSpec(memory_space=pltpu.MemorySpace.SMEM),  # b3 scalar in SMEM
    ]
    out_specs = pl.BlockSpec((out_p, tb), lambda i: (0, i))

    itemsize = jnp.dtype(cdt).itemsize
    flops = 2 * B_pad * (sd_p * hid_p + hid_p * hid_p + hid_p * out_p)
    bytes_accessed = (
        (xT.size + w1.size + w2.size + w3.size) * itemsize
        + (b1.size + b2.size + b3.size) * 4
        + out_p * B_pad * 4
    )
    cost = pl.CostEstimate(flops=int(flops), transcendentals=0,
                           bytes_accessed=int(bytes_accessed))

    # Rough VMEM budget: double-buffered inputs/outputs + f32 activations.
    # Only raise the scoped limit when the default (16 MiB on v5e) is too small;
    # cap at 64 MiB so the request is valid on v7x as well.
    vmem_est = (
        2 * (w1.size + w2.size + w3.size) * itemsize
        + 2 * (b1.size + b2.size) * 4
        + 2 * (sd_p * tb * itemsize + out_p * tb * 4)
        + 3 * hid_p * tb * 4
    )
    cp_kwargs = dict(dimension_semantics=("parallel",))
    if vmem_est > 12 * 1024 * 1024:
        cp_kwargs["vmem_limit_bytes"] = int(min(max(2 * vmem_est, 32 << 20), 64 << 20))

    out_pad = pl.pallas_call(
        _mlp_kernel,
        out_shape=jax.ShapeDtypeStruct((out_p, B_pad), f32),
        grid=grid,
        in_specs=in_specs,
        out_specs=out_specs,
        compiler_params=pltpu.CompilerParams(**cp_kwargs),
        cost_estimate=cost,
    )(xT, w1, b1, w2, b2, w3, b3)

    # Row 0 holds the real output; drop batch padding and return (B, 1).
    return out_pad[0, :B][:, None]


def init_params(key, state_dim, hidden_dim):
    """Deterministic synthetic init, PyTorch shape conventions."""
    k1, k2, k3, k4, k5, k6 = jax.random.split(key, 6)
    return {
        "w1": jax.random.normal(k1, (hidden_dim, state_dim), jnp.float32) * 0.1,
        "b1": jax.random.normal(k2, (hidden_dim,), jnp.float32) * 0.1,
        "w2": jax.random.normal(k3, (hidden_dim, hidden_dim), jnp.float32) * 0.1,
        "b2": jax.random.normal(k4, (hidden_dim,), jnp.float32) * 0.1,
        "w3": jax.random.normal(k5, (1, hidden_dim), jnp.float32) * 0.1,
        "b3": jax.random.normal(k6, (1,), jnp.float32) * 0.1,
    }


def _reference_forward(x, params, compute_dtype=jnp.float32):
    """Pure-JAX reference (mirrors the PyTorch module, same MXU input dtype)."""
    f32 = jnp.float32
    c = lambda a: a.astype(compute_dtype).astype(f32)
    h = jnp.maximum(c(x) @ c(params["w1"]).T + params["b1"].astype(f32), 0.0)
    h = jnp.maximum(c(h) @ c(params["w2"]).T + params["b2"].astype(f32), 0.0)
    return c(h) @ c(params["w3"]).T + params["b3"].astype(f32)


if __name__ == "__main__":
    batch = 8
    state_dim = 4
    hidden_dim = 10

    key = jax.random.PRNGKey(0)
    k_x, k_p = jax.random.split(key)

    x = jax.random.normal(k_x, (batch, state_dim), jnp.float32)
    params = init_params(k_p, state_dim, hidden_dim)

    # Default (bf16 MXU inputs, f32 accumulation).
    fwd_bf16 = jax.jit(functools.partial(network_forward, compute_dtype=jnp.bfloat16))
    out = jax.block_until_ready(fwd_bf16(x, params))
    ref = _reference_forward(x, params, compute_dtype=jnp.bfloat16)
    assert out.shape == (batch, 1), out.shape
    assert jnp.allclose(out, ref, atol=1e-3, rtol=1e-3), (out, ref)

    # Full-precision path.
    fwd_f32 = jax.jit(functools.partial(network_forward, compute_dtype=jnp.float32))
    out32 = jax.block_until_ready(fwd_f32(x, params))
    ref32 = _reference_forward(x, params, compute_dtype=jnp.float32)
    assert jnp.allclose(out32, ref32, atol=1e-4, rtol=1e-4), (out32, ref32)

    print("KERNEL_OK")
</pallas_src>

<mosaic_0001>
module attributes {stable_mosaic.version = 11 : i64} {
  func.func @_mlp_kernel(%arg0: i32, %arg1: memref<8x128xbf16, #tpu.memory_space<vmem>>, %arg2: memref<128x8xbf16, #tpu.memory_space<vmem>>, %arg3: memref<128x1xf32, #tpu.memory_space<vmem>>, %arg4: memref<128x128xbf16, #tpu.memory_space<vmem>>, %arg5: memref<128x1xf32, #tpu.memory_space<vmem>>, %arg6: memref<8x128xbf16, #tpu.memory_space<vmem>>, %arg7: memref<1x1xf32, #tpu.memory_space<smem>>, %arg8: memref<8x128xf32, #tpu.memory_space<vmem>>) attributes {dimension_semantics = [#tpu.dimension_semantics<parallel>], iteration_bounds = array<i64: 1>, scalar_prefetch = 0 : i64, scratch_operands = 0 : i64, tpu.core_type = #tpu.core_type<tc>, window_params = [{transform_indices = @transform_0, window_bounds = array<i64: 8, 128>}, {pipeline_mode = #tpu.pipeline_mode<synchronous>, transform_indices = @transform_1, window_bounds = array<i64: 128, 8>}, {pipeline_mode = #tpu.pipeline_mode<synchronous>, transform_indices = @transform_2, window_bounds = array<i64: 128, 1>}, {pipeline_mode = #tpu.pipeline_mode<synchronous>, transform_indices = @transform_3, window_bounds = array<i64: 128, 128>}, {pipeline_mode = #tpu.pipeline_mode<synchronous>, transform_indices = @transform_4, window_bounds = array<i64: 128, 1>}, {pipeline_mode = #tpu.pipeline_mode<synchronous>, transform_indices = @transform_5, window_bounds = array<i64: 8, 128>}, {transform_indices = @transform_6, window_bounds = array<i64: 1, 1>}, {transform_indices = @transform_7, window_bounds = array<i64: 8, 128>}]} {
    %c0 = arith.constant 0 : index
    %c0_0 = arith.constant 0 : index
    %0 = vector.load %arg2[%c0, %c0_0] : memref<128x8xbf16, #tpu.memory_space<vmem>>, vector<128x8xbf16>
    %c0_1 = arith.constant 0 : index
    %c0_2 = arith.constant 0 : index
    %1 = vector.load %arg1[%c0_1, %c0_2] : memref<8x128xbf16, #tpu.memory_space<vmem>>, vector<8x128xbf16>
    %cst = arith.constant dense<0.000000e+00> : vector<128x128xf32>
    %2 = tpu.matmul %0, %1, %cst {dimension_numbers = #tpu.dot_dimension_numbers<[1], [0], [0], [1], [0, 0, 1, 1], [], []>} : vector<128x8xbf16>, vector<8x128xbf16>, vector<128x128xf32> -> vector<128x128xf32>
    %c0_3 = arith.constant 0 : index
    %c0_4 = arith.constant 0 : index
    %3 = vector.load %arg3[%c0_3, %c0_4] : memref<128x1xf32, #tpu.memory_space<vmem>>, vector<128x1xf32>
    %4 = vector.broadcast %3 : vector<128x1xf32> to vector<128x128xf32>
    %5 = arith.addf %2, %4 : vector<128x128xf32>
    %cst_5 = arith.constant 0.000000e+00 : f32
    %6 = vector.broadcast %cst_5 : f32 to vector<128x128xf32>
    %7 = arith.maximumf %5, %6 : vector<128x128xf32>
    %c0_6 = arith.constant 0 : index
    %c0_7 = arith.constant 0 : index
    %8 = vector.load %arg4[%c0_6, %c0_7] : memref<128x128xbf16, #tpu.memory_space<vmem>>, vector<128x128xbf16>
    %9 = arith.truncf %7 : vector<128x128xf32> to vector<128x128xbf16>
    %cst_8 = arith.constant dense<0.000000e+00> : vector<128x128xf32>
    %10 = tpu.matmul %8, %9, %cst_8 {dimension_numbers = #tpu.dot_dimension_numbers<[1], [0], [0], [1], [0, 0, 1, 1], [], []>} : vector<128x128xbf16>, vector<128x128xbf16>, vector<128x128xf32> -> vector<128x128xf32>
    %c0_9 = arith.constant 0 : index
    %c0_10 = arith.constant 0 : index
    %11 = vector.load %arg5[%c0_9, %c0_10] : memref<128x1xf32, #tpu.memory_space<vmem>>, vector<128x1xf32>
    %12 = vector.broadcast %11 : vector<128x1xf32> to vector<128x128xf32>
    %13 = arith.addf %10, %12 : vector<128x128xf32>
    %cst_11 = arith.constant 0.000000e+00 : f32
    %14 = vector.broadcast %cst_11 : f32 to vector<128x128xf32>
    %15 = arith.maximumf %13, %14 : vector<128x128xf32>
    %c0_12 = arith.constant 0 : index
    %c0_13 = arith.constant 0 : index
    %16 = vector.load %arg6[%c0_12, %c0_13] : memref<8x128xbf16, #tpu.memory_space<vmem>>, vector<8x128xbf16>
    %17 = arith.truncf %15 : vector<128x128xf32> to vector<128x128xbf16>
    %cst_14 = arith.constant dense<0.000000e+00> : vector<8x128xf32>
    %18 = tpu.matmul %16, %17, %cst_14 {dimension_numbers = #tpu.dot_dimension_numbers<[1], [0], [0], [1], [0, 0, 1, 1], [], []>} : vector<8x128xbf16>, vector<128x128xbf16>, vector<8x128xf32> -> vector<8x128xf32>
    %c0_15 = arith.constant 0 : index
    %c0_16 = arith.constant 0 : index
    %19 = memref.load %arg7[%c0_15, %c0_16] : memref<1x1xf32, #tpu.memory_space<smem>>
    %20 = vector.broadcast %19 : f32 to vector<8x128xf32>
    %21 = arith.addf %18, %20 : vector<8x128xf32>
    %c0_17 = arith.constant 0 : index
    %c0_18 = arith.constant 0 : index
    %22 = vector.load %arg8[%c0_17, %c0_18] : memref<8x128xf32, #tpu.memory_space<vmem>>, vector<8x128xf32>
    tpu.vector_store %arg8[%c0_17, %c0_18], %21 {strides = array<i32>} : memref<8x128xf32, #tpu.memory_space<vmem>>, vector<8x128xf32>,
    return
  }
  func.func @transform_0(%arg0: i32) -> (i32, i32) {
    %c0_i32 = arith.constant 0 : i32
    %c0_i32_0 = arith.constant 0 : i32
    return %c0_i32, %arg0 : i32, i32
  }
  func.func @transform_1(%arg0: i32) -> (i32, i32) {
    %c0_i32 = arith.constant 0 : i32
    %c0_i32_0 = arith.constant 0 : i32
    %c0_i32_1 = arith.constant 0 : i32
    return %c0_i32, %c0_i32_0 : i32, i32
  }
  func.func @transform_2(%arg0: i32) -> (i32, i32) {
    %c0_i32 = arith.constant 0 : i32
    %c0_i32_0 = arith.constant 0 : i32
    %c0_i32_1 = arith.constant 0 : i32
    return %c0_i32, %c0_i32_0 : i32, i32
  }
  func.func @transform_3(%arg0: i32) -> (i32, i32) {
    %c0_i32 = arith.constant 0 : i32
    %c0_i32_0 = arith.constant 0 : i32
    %c0_i32_1 = arith.constant 0 : i32
    return %c0_i32, %c0_i32_0 : i32, i32
  }
  func.func @transform_4(%arg0: i32) -> (i32, i32) {
    %c0_i32 = arith.constant 0 : i32
    %c0_i32_0 = arith.constant 0 : i32
    %c0_i32_1 = arith.constant 0 : i32
    return %c0_i32, %c0_i32_0 : i32, i32
  }
  func.func @transform_5(%arg0: i32) -> (i32, i32) {
    %c0_i32 = arith.constant 0 : i32
    %c0_i32_0 = arith.constant 0 : i32
    %c0_i32_1 = arith.constant 0 : i32
    return %c0_i32, %c0_i32_0 : i32, i32
  }
  func.func @transform_6(%arg0: i32) -> (i32, i32) {
    %c0_i32 = arith.constant 0 : i32
    %c0_i32_0 = arith.constant 0 : i32
    %c0_i32_1 = arith.constant 0 : i32
    return %c0_i32, %c0_i32_0 : i32, i32
  }
  func.func @transform_7(%arg0: i32) -> (i32, i32) {
    %c0_i32 = arith.constant 0 : i32
    %c0_i32_0 = arith.constant 0 : i32
    return %c0_i32, %arg0 : i32, i32
  }
}

</mosaic_0001>

<bundles_post_ra>
// kernel: network_forward.1
= control target key start
LH: loop header
LB: loop body
LE: loop exit
PB: predicated region body
PF: predicated region fallthrough
CT: control target
= control target key end

     0   :  { %vm206_vm0 = vcmask 1043456   ;;  %vm181_vm1 = vcmask 64512   ;;  %v810_v1 = vmov 0   ;;  %vm812_vm2 = vmmov 0   ;;  %s1044_s0 = inlined_call_operand.vmem [shape: bf16[8,128], index: 0, kind: input, shape index: {}]   ;;  %s1045_s1 = inlined_call_operand.vmem [shape: bf16[128,8], index: 1, kind: input, shape index: {}]   ;;  %s1046_s2 = inlined_call_operand.vmem [shape: f32[128,1], index: 2, kind: input, shape index: {}]   ;;  %s1047_s4 = inlined_call_operand.vmem [shape: f32[128,1], index: 4, kind: input, shape index: {}]   ;;  %s1048_s3 = inlined_call_operand.vmem [shape: bf16[128,128], index: 3, kind: input, shape index: {}]   ;;  %s1049_s5 = inlined_call_operand.vmem [shape: bf16[8,128], index: 5, kind: input, shape index: {}]   ;;  %s1050_s6 = inlined_call_operand.<no memory space> [shape: f32[1,1], index: 6, kind: input, shape index: {}]   ;;  %s1051_s7 = inlined_call_operand.vmem [shape: f32[8,128], index: 7, kind: output, shape index: {}]  }
   0x1   :  { %v44_v0 = vld [vmem:[%s1044_s0] sm:$0xf]  ;;  %792 = vset.pattern.permute.xlu0 %v810_v1  ;;  %793 = vset.pattern.permute.xlu1 %v810_v1  ;;  %v795_v4 = vld [vmem:[%s1045_s1 + $0x8] sm:$0xff]   ;;  %v796_v5 = vld [vmem:[%s1045_s1 + $0x10] sm:$0xff]  }
   0x2   :  { %788 = vmatprep.subr.msk.bf16.mxu0 %vm206_vm0, %v44_v0  ;;  %v208_v2 = vsel %vm206_vm0, %v44_v0, 0  ;;  %v794_v3 = vld [vmem:[%s1045_s1] sm:$0xff]   ;;  %v59_v6 = vld [vmem:[%s1046_s2 + $0x70] sm:$0xff]  ;;  %v797_v7 = vld [vmem:[%s1045_s1 + $0x18] sm:$0xff]  }
   0x3   :  { %719 = vmatpush3.bf16.msra.mxu0 %v208_v2  ;;  %720 = vmatprep.mubr.msk.bf16.mxu0 %vm181_vm1, %v794_v3  ;;  %v57_v8 = vld [vmem:[%s1046_s2 + $0x60] sm:$0xff]  ;;  %v60_v10 = vld [vmem:[%s1046_s2 + $0x78] sm:$0xff]  ;;  %v58_v11 = vld [vmem:[%s1046_s2 + $0x68] sm:$0xff] }
   0x4   :  { %133 = vperm.xlu0 %792, %v59_v6   ;;  %v798_v9 = vld [vmem:[%s1045_s1 + $0x20] sm:$0xff]   ;;  %123 = vperm.xlu1 %793, %v57_v8   ;;  %v55_v12 = vld [vmem:[%s1046_s2 + $0x50] sm:$0xff]  ;;  %v56_v13 = vld [vmem:[%s1046_s2 + $0x58] sm:$0xff] }
   0x5   :  { %v799_v14 = vld [vmem:[%s1045_s1 + $0x28] sm:$0xff]   ;;  %v800_v15 = vld [vmem:[%s1045_s1 + $0x30] sm:$0xff]   ;;  %v53_v16 = vld [vmem:[%s1046_s2 + $0x40] sm:$0xff] }
   0x6   :  { %721 = vmatmul.mubr.msk.bf16.vlgmr.msra.gmra.mxu0 %vm181_vm1, %v795_v4  ;;  %v54_v17 = vld [vmem:[%s1046_s2 + $0x48] sm:$0xff]  ;;  %v51_v18 = vld [vmem:[%s1046_s2 + $0x30] sm:$0xff]  ;;  %v52_v19 = vld [vmem:[%s1046_s2 + $0x38] sm:$0xff] }
   0x7   :  { %724 = vmatprep.mubr.msk.bf16.mxu0 %vm181_vm1, %v796_v5  ;;  %v801_v20 = vld [vmem:[%s1045_s1 + $0x38] sm:$0xff]   ;;  %v49_v21 = vld [vmem:[%s1046_s2 + $0x20] sm:$0xff]  ;;  %v50_v22 = vld [vmem:[%s1046_s2 + $0x28] sm:$0xff] }
   0x8   :  { %138 = vperm.xlu0 %792, %v60_v10   ;;  %128 = vperm.xlu1 %793, %v58_v11   ;;  %v47_v23 = vld [vmem:[%s1046_s2 + $0x10] sm:$0xff]  ;;  %v48_v24 = vld [vmem:[%s1046_s2 + $0x18] sm:$0xff]  ;;  %v45_v25 = vld [vmem:[%s1046_s2] sm:$0xff] }
   0x9   :  { %v46_v26 = vld [vmem:[%s1046_s2 + $0x8] sm:$0xff]  ;;  %v361_v27 = vld [vmem:[%s1047_s4 + $0x70] sm:$0xff]  ;;  %v362_v28 = vld [vmem:[%s1047_s4 + $0x78] sm:$0xff] }
   0xa   :  { %v359_v29 = vld [vmem:[%s1047_s4 + $0x60] sm:$0xff]  ;;  %v360_v30 = vld [vmem:[%s1047_s4 + $0x68] sm:$0xff]  ;;  %v357_v31 = vld [vmem:[%s1047_s4 + $0x50] sm:$0xff] }
   0xb   :  { %v358_v32 = vld [vmem:[%s1047_s4 + $0x58] sm:$0xff]  ;;  %v355_v33 = vld [vmem:[%s1047_s4 + $0x40] sm:$0xff]  ;;  %v356_v34 = vld [vmem:[%s1047_s4 + $0x48] sm:$0xff] }
   0xc   :  { %113 = vperm.xlu0 %792, %v55_v12   ;;  %118 = vperm.xlu1 %793, %v56_v13   ;;  %v353_v35 = vld [vmem:[%s1047_s4 + $0x30] sm:$0xff]  ;;  %v354_v36 = vld [vmem:[%s1047_s4 + $0x38] sm:$0xff]  ;;  %v351_v37 = vld [vmem:[%s1047_s4 + $0x20] sm:$0xff] }
   0xd   :  { %v352_v38 = vld [vmem:[%s1047_s4 + $0x28] sm:$0xff]  ;;  %v349_v39 = vld [vmem:[%s1047_s4 + $0x10] sm:$0xff]  ;;  %v350_v40 = vld [vmem:[%s1047_s4 + $0x18] sm:$0xff] }
   0xe   :  { %725 = vmatmul.mubr.msk.bf16.gmra.mxu0 %vm181_vm1, %v797_v7  ;;  %v347_v41 = vld [vmem:[%s1047_s4] sm:$0xff]  ;;  %v348_v42 = vld [vmem:[%s1047_s4 + $0x8] sm:$0xff] }
   0xf   :  { %728 = vmatprep.mubr.msk.bf16.mxu0 %vm181_vm1, %v798_v9  ;;  %v802_v43 = vld [vmem:[%s1048_s3] sm:$0xff]  }
  0x10   :  { %103 = vperm.xlu0 %792, %v53_v16   ;;  %108 = vperm.xlu1 %793, %v54_v17  }
  0x11   :  { %752 = vmatprep.mubr.bf16.mxu1 %v802_v43 }
  0x14   :  { %93 = vperm.xlu0 %792, %v51_v18   ;;  %98 = vperm.xlu1 %793, %v52_v19  }
  0x16   :  { %729 = vmatmul.mubr.msk.bf16.gmra.mxu0 %vm181_vm1, %v799_v14 }
  0x17   :  { %732 = vmatprep.mubr.msk.bf16.mxu0 %vm181_vm1, %v800_v15 }
  0x18   :  { %83 = vperm.xlu0 %792, %v49_v21   ;;  %88 = vperm.xlu1 %793, %v50_v22  }
  0x1c   :  { %73 = vperm.xlu0 %792, %v47_v23   ;;  %78 = vperm.xlu1 %793, %v48_v24  }
  0x1e   :  { %733 = vmatmul.mubr.msk.bf16.gmra.mxu0 %vm181_vm1, %v801_v20 }
  0x20   :  { %63 = vperm.xlu0 %792, %v45_v25   ;;  %68 = vperm.xlu1 %793, %v46_v26  }
  0x24   :  { %435 = vperm.xlu0 %792, %v361_v27   ;;  %440 = vperm.xlu1 %793, %v362_v28  }
  0x28   :  { %425 = vperm.xlu0 %792, %v359_v29   ;;  %430 = vperm.xlu1 %793, %v360_v30  }
  0x2c   :  { %415 = vperm.xlu0 %792, %v357_v31   ;;  %420 = vperm.xlu1 %793, %v358_v32  }
  0x30   :  { %405 = vperm.xlu0 %792, %v355_v33   ;;  %410 = vperm.xlu1 %793, %v356_v34  }
  0x34   :  { %395 = vperm.xlu0 %792, %v353_v35   ;;  %400 = vperm.xlu1 %793, %v354_v36  }
  0x38   :  { %385 = vperm.xlu0 %792, %v351_v37   ;;  %390 = vperm.xlu1 %793, %v352_v38  }
  0x3c   :  { %375 = vperm.xlu0 %792, %v349_v39   ;;  %380 = vperm.xlu1 %793, %v350_v40  }
  0x40   :  { %365 = vperm.xlu0 %792, %v347_v41   ;;  %370 = vperm.xlu1 %793, %v348_v42  }
  0x7f   :  { %v124_v48 = vpop.permute.xlu1 %123  ;;  %v134_v50 = vpop.permute.xlu0 %133 }
  0x83   :  { %v129_v53 = vpop.permute.xlu1 %128  ;;  %v139_v55 = vpop.permute.xlu0 %138 }
  0x87   :  { %v119_v58 = vpop.permute.xlu1 %118  ;;  %v114_v60 = vpop.permute.xlu0 %113 }
  0x8b   :  { %v109_v63 = vpop.permute.xlu1 %108  ;;  %v104_v2 = vpop.permute.xlu0 %103 }
  0x8f   :  { %v99_v11 = vpop.permute.xlu1 %98  ;;  %v94_v16 = vpop.permute.xlu0 %93 }
  0x93   :  { %v89_v22 = vpop.permute.xlu1 %88  ;;  %v84_v26 = vpop.permute.xlu0 %83 }
  0x97   :  { %v79_v32 = vpop.permute.xlu1 %78  ;;  %v74_v35 = vpop.permute.xlu0 %73 }
  0x9b   :  { %v69_v41 = vpop.permute.xlu1 %68 }
  0xc6   :  { %v987_v44 = vpop.f32.mrf.mxu0 }
  0xc7   :  { %v253_v39 = vadd.f32 %v987_v44, %v74_v35  ;;  %v803_v44 = vld [vmem:[%s1048_s3 + $0x8] sm:$0xff]  }
  0xc8   :  { %v989_v45 = vpop.f32.mrf.mxu0 }
  0xca   :  { %v723_v46 = vpop.f32.mrf.mxu0 }
  0xcb   :  { %v256_v36 = vadd.f32 %v723_v46, %v79_v32 }
  0xcc   :  { %v991_v47 = vpop.f32.mrf.mxu0 }
  0xcd   :  { %v310_v42 = vmax.f32 %v256_v36, 0.0  ;;  %v248_v43 = vadd.f32 %v991_v47, %v69_v41  ;;  %v804_v47 = vld [vmem:[%s1048_s3 + $0x10] sm:$0xff]  }
  0xce   :  { %v726_v49 = vpop.f32.mrf.mxu0 }
  0xcf   :  { %v269_v27 = vadd.f32 %v726_v49, %v94_v16  ;;  %v64_v49 = vpop.permute.xlu0 %63  ;;  %v308_v46 = vmax.f32 %v248_v43, 0.0 }
  0xd0   :  { %v260_v51 = vpop.f32.mrf.mxu0 }
  0xd1   :  { %v313_v33 = vmax.f32 %v269_v27, 0.0  ;;  %v261_v34 = vadd.f32 %v260_v51, %v84_v26  ;;  %v245_v51 = vadd.f32 %v989_v45, %v64_v49  ;;  %v805_v45 = vld [vmem:[%s1048_s3 + $0x18] sm:$0xff]  }
  0xd2   :  { %v727_v52 = vpop.f32.mrf.mxu0 }
  0xd3   :  { %v272_v23 = vadd.f32 %v727_v52, %v99_v11  ;;  %v311_v40 = vmax.f32 %v261_v34, 0.0 }
  0xd4   :  { %v263_v54 = vpop.f32.mrf.mxu0 }
  0xd5   :  { %v314_v29 = vmax.f32 %v272_v23, 0.0  ;;  %v264_v30 = vadd.f32 %v263_v54, %v89_v22 }
  0xd6   :  { %v730_v56 = vpop.f32.mrf.mxu0 }
  0xd7   :  { %v285_v12 = vadd.f32 %v730_v56, %v114_v60  ;;  %v342_v37 = vpack.c.bf16 %v314_v29, %v313_v33  ;;  %v312_v38 = vmax.f32 %v264_v30, 0.0  ;;  %v807_v56 = vld [vmem:[%s1048_s3 + $0x28] sm:$0xff]  }
  0xd8   :  { %v276_v57 = vpop.f32.mrf.mxu0 }
  0xd9   :  { %v317_v20 = vmax.f32 %v285_v12, 0.0  ;;  %v277_v21 = vadd.f32 %v276_v57, %v104_v2  ;;  %v808_v57 = vld [vmem:[%s1048_s3 + $0x30] sm:$0xff]  }
  0xda   :  { %v731_v59 = vpop.f32.mrf.mxu0 }
  0xdb   :  { %v288_v7 = vadd.f32 %v731_v59, %v119_v58  ;;  %v315_v28 = vmax.f32 %v277_v21, 0.0  ;;  %v809_v58 = vld [vmem:[%s1048_s3 + $0x38] sm:$0xff]   ;;  %v811_v59 = vmov 0.0  }
  0xdc   :  { %v279_v61 = vpop.f32.mrf.mxu0  ;;  %768 = vmatprep.subr.bf16.mxu0 %v811_v59  ;;  %784 = vmatprep.mubr.msk.bf16.mxu0 %vm812_vm2, %v811_v59 }
  0xdd   :  { %v318_v17 = vmax.f32 %v288_v7, 0.0  ;;  %v280_v18 = vadd.f32 %v279_v61, %v109_v63 }
  0xde   :  { %v734_v62 = vpop.f32.mrf.mxu0 }
  0xdf   :  { %v301_v1 = vadd.f32 %v734_v62, %v134_v50  ;;  %v344_v24 = vpack.c.bf16 %v318_v17, %v317_v20  ;;  %v316_v25 = vmax.f32 %v280_v18, 0.0  ;;  %v309_v50 = vmax.f32 %v253_v39, 0.0 }
  0xe0   :  { %v292_v0 = vpop.f32.mrf.mxu0 }
  0xe1   :  { %v293_v4 = vadd.f32 %v292_v0, %v124_v48  ;;  %v321_v8 = vmax.f32 %v301_v1, 0.0  ;;  %v343_v31 = vpack.c.bf16 %v316_v25, %v315_v28  ;;  %v341_v48 = vpack.c.bf16 %v312_v38, %v311_v40  ;;  %v441_v1 = vpop.permute.xlu1 %440 }
  0xe2   :  { %v735_v3 = vpop.f32.mrf.mxu0  ;;  %v340_v52 = vpack.c.bf16 %v310_v42, %v309_v50 }
  0xe3   :  { %v304_v5 = vadd.f32 %v735_v3, %v139_v55  ;;  %v319_v13 = vmax.f32 %v293_v4, 0.0  ;;  %v806_v55 = vld [vmem:[%s1048_s3 + $0x20] sm:$0xff]   ;;  %v436_v3 = vpop.permute.xlu0 %435 }
  0xe4   :  { %v295_v6 = vpop.f32.mrf.mxu0 }
  0xe5   :  { %v322_v9 = vmax.f32 %v304_v5, 0.0  ;;  %v296_v10 = vadd.f32 %v295_v6, %v129_v53  ;;  %v307_v53 = vmax.f32 %v245_v51, 0.0  ;;  %v431_v6 = vpop.permute.xlu1 %430 }
  0xe7   :  { %v320_v14 = vmax.f32 %v296_v10, 0.0  ;;  %v346_v15 = vpack.c.bf16 %v322_v9, %v321_v8  ;;  %v339_v54 = vpack.c.bf16 %v308_v46, %v307_v53  ;;  %v426_v8 = vpop.permute.xlu0 %425 }
  0xe9   :  { %v345_v19 = vpack.c.bf16 %v320_v14, %v319_v13  ;;  %736 = vmatprep.subr.bf16.mxu1 %v346_v15  ;;  %v421_v11 = vpop.permute.xlu1 %420 }
  0xea   :  { %737 = vmatpush3.bf16.msra.mxu1 %v346_v15 }
  0xeb   :  { %738 = vmatprep.subr.bf16.mxu1 %v345_v19  ;;  %v416_v13 = vpop.permute.xlu0 %415 }
  0xed   :  { %v411_v17 = vpop.permute.xlu1 %410 }
  0xee   :  { %739 = vmatpush3.bf16.msra.mxu1 %v345_v19 }
  0xef   :  { %740 = vmatprep.subr.bf16.mxu1 %v344_v24  ;;  %v406_v20 = vpop.permute.xlu0 %405 }
  0xf1   :  { %v401_v29 = vpop.permute.xlu1 %400 }
  0xf2   :  { %741 = vmatpush3.bf16.msra.mxu1 %v344_v24 }
  0xf3   :  { %742 = vmatprep.subr.bf16.mxu1 %v343_v31  ;;  %v396_v32 = vpop.permute.xlu0 %395 }
  0xf5   :  { %v391_v38 = vpop.permute.xlu1 %390 }
  0xf6   :  { %743 = vmatpush3.bf16.msra.mxu1 %v343_v31 }
  0xf7   :  { %744 = vmatprep.subr.bf16.mxu1 %v342_v37  ;;  %v386_v42 = vpop.permute.xlu0 %385 }
  0xfa   :  { %745 = vmatpush3.bf16.msra.mxu1 %v342_v37 }
  0xfb   :  { %746 = vmatprep.subr.bf16.mxu1 %v341_v48 }
  0xfe   :  { %747 = vmatpush3.bf16.msra.mxu1 %v341_v48 }
  0xff   :  { %748 = vmatprep.subr.bf16.mxu1 %v340_v52 }
 0x102   :  { %749 = vmatpush3.bf16.msra.mxu1 %v340_v52  ;;  %v381_v52 = vpop.permute.xlu1 %380 }
 0x103   :  { %750 = vmatprep.subr.bf16.mxu1 %v339_v54 }
 0x106   :  { %751 = vmatpush3.bf16.msra.mxu1 %v339_v54  ;;  %v376_v54 = vpop.permute.xlu0 %375 }
 0x109   :  { %753 = vmatmul.mubr.bf16.vlgmr.msra.gmra.mxu1 %v803_v44 }
 0x10a   :  { %756 = vmatprep.mubr.bf16.mxu1 %v804_v47 }
 0x111   :  { %757 = vmatmul.mubr.bf16.gmra.mxu1 %v805_v45 }
 0x112   :  { %760 = vmatprep.mubr.bf16.mxu1 %v806_v55 }
 0x119   :  { %761 = vmatmul.mubr.bf16.gmra.mxu1 %v807_v56 }
 0x11a   :  { %764 = vmatprep.mubr.bf16.mxu1 %v808_v57  ;;  %v371_v57 = vpop.permute.xlu1 %370 }
 0x121   :  { %765 = vmatmul.mubr.bf16.gmra.mxu1 %v809_v58 }
 0x1c9   :  { %v1019_v60 = vpop.f32.mrf.mxu1 }
 0x1ca   :  { %v534_v55 = vadd.f32 %v1019_v60, %v376_v54 }
 0x1cb   :  { %v1021_v61 = vpop.f32.mrf.mxu1 }
 0x1cd   :  { %v755_v62 = vpop.f32.mrf.mxu1 }
 0x1ce   :  { %v537_v44 = vadd.f32 %v755_v62, %v381_v52 }
 0x1cf   :  { %v1023_v63 = vpop.f32.mrf.mxu1 }
 0x1d0   :  { %v591_v58 = vmax.f32 %v537_v44, 0.0 }
 0x1d1   :  { %v758_v0 = vpop.f32.mrf.mxu1 }
 0x1d2   :  { %v550_v43 = vadd.f32 %v758_v0, %v396_v32  ;;  %v529_v0 = vadd.f32 %v1023_v63, %v371_v57  ;;  %v604_v63 = vld [vmem:[%s1049_s5] sm:$0xf] }
 0x1d3   :  { %v541_v2 = vpop.f32.mrf.mxu1 }
 0x1d4   :  { %v594_v46 = vmax.f32 %v550_v43, 0.0  ;;  %v542_v53 = vadd.f32 %v541_v2, %v386_v42  ;;  %v590_v2 = vmax.f32 %v534_v55, 0.0 }
 0x1d5   :  { %v759_v4 = vpop.f32.mrf.mxu1 }
 0x1d6   :  { %v553_v39 = vadd.f32 %v759_v4, %v401_v29  ;;  %v592_v56 = vmax.f32 %v542_v53, 0.0  ;;  %v606_v62 = vpack.c.bf16 %v591_v58, %v590_v2 }
 0x1d7   :  { %v544_v5 = vpop.f32.mrf.mxu1 }
 0x1d8   :  { %v595_v49 = vmax.f32 %v553_v39, 0.0  ;;  %v545_v50 = vadd.f32 %v544_v5, %v391_v38  ;;  %v589_v5 = vmax.f32 %v529_v0, 0.0 }
 0x1d9   :  { %v762_v7 = vpop.f32.mrf.mxu1 }
 0x1da   :  { %v566_v30 = vadd.f32 %v762_v7, %v416_v13  ;;  %v608_v47 = vpack.c.bf16 %v595_v49, %v594_v46  ;;  %v593_v45 = vmax.f32 %v545_v50, 0.0 }
 0x1db   :  { %v557_v9 = vpop.f32.mrf.mxu1 }
 0x1dc   :  { %v598_v36 = vmax.f32 %v566_v30, 0.0  ;;  %v558_v37 = vadd.f32 %v557_v9, %v406_v20 }
 0x1dd   :  { %v763_v10 = vpop.f32.mrf.mxu1 }
 0x1de   :  { %v569_v26 = vadd.f32 %v763_v10, %v421_v11  ;;  %v596_v48 = vmax.f32 %v558_v37, 0.0 }
 0x1df   :  { %v560_v12 = vpop.f32.mrf.mxu1 }
 0x1e0   :  { %v599_v33 = vmax.f32 %v569_v26, 0.0  ;;  %v561_v34 = vadd.f32 %v560_v12, %v411_v17 }
 0x1e1   :  { %v766_v14 = vpop.f32.mrf.mxu1 }
 0x1e2   :  { %v582_v16 = vadd.f32 %v766_v14, %v436_v3  ;;  %v610_v40 = vpack.c.bf16 %v599_v33, %v598_v36  ;;  %v597_v41 = vmax.f32 %v561_v34, 0.0  ;;  %v366_v3 = vpop.permute.xlu0 %365 }
 0x1e3   :  { %v573_v15 = vpop.f32.mrf.mxu1  ;;  %v526_v4 = vadd.f32 %v1021_v61, %v366_v3  ;;  %v614_v61 = vstv %s1050_s6 }
 0x1e4   :  { %v602_v22 = vmax.f32 %v582_v16, 0.0  ;;  %v574_v23 = vadd.f32 %v573_v15, %v426_v8  ;;  %v609_v51 = vpack.c.bf16 %v597_v41, %v596_v48 }
 0x1e5   :  { %v767_v18 = vpop.f32.mrf.mxu1 }
 0x1e6   :  { %v585_v19 = vadd.f32 %v767_v18, %v441_v1  ;;  %v600_v31 = vmax.f32 %v574_v23, 0.0  ;;  %v607_v1 = vpack.c.bf16 %v593_v45, %v592_v56 }
 0x1e7   :  { %v576_v21 = vpop.f32.mrf.mxu1 }
 0x1e8   :  { %v603_v24 = vmax.f32 %v585_v19, 0.0  ;;  %v577_v25 = vadd.f32 %v576_v21, %v431_v6  ;;  %v588_v6 = vmax.f32 %v526_v4, 0.0 }
 0x1ea   :  { %v612_v27 = vpack.c.bf16 %v603_v24, %v602_v22  ;;  %v601_v28 = vmax.f32 %v577_v25, 0.0  ;;  %v605_v60 = vpack.c.bf16 %v589_v5, %v588_v6 }
 0x1ec   :  { %769 = vmatpush3.bf16.msra.mxu0 %v612_v27  ;;  %v611_v35 = vpack.c.bf16 %v601_v28, %v600_v31 }
 0x1ed   :  { %770 = vmatprep.subr.bf16.mxu0 %v811_v59 }
 0x1f0   :  { %771 = vmatpush3.bf16.msra.mxu0 %v611_v35 }
 0x1f1   :  { %772 = vmatprep.subr.bf16.mxu0 %v811_v59 }
 0x1f4   :  { %773 = vmatpush3.bf16.msra.mxu0 %v610_v40 }
 0x1f5   :  { %774 = vmatprep.subr.bf16.mxu0 %v811_v59 }
 0x1f8   :  { %775 = vmatpush3.bf16.msra.mxu0 %v609_v51 }
 0x1f9   :  { %776 = vmatprep.subr.bf16.mxu0 %v811_v59 }
 0x1fc   :  { %777 = vmatpush3.bf16.msra.mxu0 %v608_v47 }
 0x1fd   :  { %778 = vmatprep.subr.bf16.mxu0 %v811_v59 }
 0x200   :  { %779 = vmatpush3.bf16.msra.mxu0 %v607_v1 }
 0x201   :  { %780 = vmatprep.subr.bf16.mxu0 %v811_v59 }
 0x204   :  { %781 = vmatpush3.bf16.msra.mxu0 %v606_v62 }
 0x205   :  { %782 = vmatprep.subr.bf16.mxu0 %v811_v59 }
 0x208   :  { %783 = vmatpush3.bf16.msra.mxu0 %v605_v60 }
 0x20b   :  { %785 = vmatmul.mubr.bf16.vlgmr.msra.gmra.mxu0 %v604_v63 }
 0x2cb   :  { %v649_v7 = vpop.f32.mrf.mxu0 }
 0x2cc   :  { %v650_v8 = vadd.f32 %v649_v7, %v614_v61 }
 0x2cd   :  { %v786_v9 = vpop.f32.mrf.mxu0 }
 0x2ce   :  { %655 = vst [vmem:[%s1051_s7] sm:$0xff] %v650_v8 }
 0x2cf   :  { %v652_v10 = vpop.f32.mrf.mxu0 }
 0x2d1   :  { %v787_v59 = vpop.f32.mrf.mxu0 }

</bundles_post_ra>
